<compile_context>
chip_gen: v7x
topology: tpu7x:2x2x1
jax: 0.10.0
libtpu: 0.0.40
codegen_flags: <defaults>
</compile_context>

<pallas_src>
import numpy as np

import jax
import jax.numpy as jnp
from jax import lax
from jax.experimental import pallas as pl
from jax.experimental.pallas import tpu as pltpu

EPS = 1e-5
_HALO = 128          # halo block width (lanes); TL is always a multiple of it
_TARGET_TL = 2048    # target output lanes per tile


def _round_up(x, m):
    return ((x + m - 1) // m) * m


def _vmem_limit_bytes():
    """Generation-aware VMEM limit (~3/4 of physical; 48 MiB on v7x, 96 MiB on v5e/v6e)."""
    try:
        cap = int(pltpu.get_tpu_info().vmem_capacity_bytes)
    except Exception:
        cap = 0
    if cap <= 0:
        cap = 64 * 1024 * 1024
    return max(32 * 1024 * 1024, (cap * 3) // 4)


# ---------------------------------------------------------------------------
# Pallas kernel: fused Conv1d (+ optional BN epilogue) + ReLU (+ residual add)
# One (batch, L-tile) grid point; everything lane-dense: tiles are (C, TL).
# ---------------------------------------------------------------------------
def _make_conv_kernel(Q, TL, emit_raw, add_residual, mask_limit):
    def kernel(*refs):
        i = 0
        xm_ref = refs[i]; i += 1          # (SC, TL)       bf16   main window
        xh_ref = refs[i]; i += 1          # (SC, HALO)     bf16   halo window
        w_ref = refs[i]; i += 1           # (C_out, Q*SC)  bf16   packed taps
        b_ref = refs[i]; i += 1           # (C_out, 1)     f32    bias
        s_ref = t_ref = None
        if emit_raw:
            s_ref = refs[i]; i += 1       # (C_out, 1) f32  this layer's BN scale
            t_ref = refs[i]; i += 1       # (C_out, 1) f32  this layer's BN shift
        r_ref = e_ref = None
        if add_residual:
            r_ref = refs[i]; i += 1       # (C0, TL)    f32  raw first-conv tile
            e_ref = refs[i]; i += 1       # (C_out, C0) f32  one-hot nearest expand
        outs = list(refs[i:])             # [raw?, act]

        # Build the merged-contraction operand: Q unit-step taps stacked along
        # sublanes.  Stacking is done in f32 (8-row pieces are tile-aligned),
        # then packed back to bf16 for the MXU.
        xm = xm_ref[...].astype(jnp.float32)
        if Q > 1:
            z = jnp.concatenate([xm, xh_ref[...].astype(jnp.float32)], axis=1)
            patch = jnp.concatenate([z[:, q:q + TL] for q in range(Q)], axis=0)
        else:
            patch = xm

        acc = jnp.dot(w_ref[...], patch.astype(jnp.bfloat16),
                      preferred_element_type=jnp.float32)          # (C_out, TL)
        acc = acc + b_ref[...]

        if emit_raw:                      # raw conv output 'f' (pre-BN/ReLU)
            outs[0][...] = acc.astype(outs[0].dtype)
            outs = outs[1:]
            acc = acc * s_ref[...] + t_ref[...]                     # eval BN
        acc = jnp.maximum(acc, 0.0)                                 # ReLU
        if add_residual:                  # fused nearest channel-interp residual
            acc = acc + jnp.dot(e_ref[...], r_ref[...],
                                preferred_element_type=jnp.float32)
        if mask_limit is not None:        # zero the padded tail (feeds next conv)
            lane = lax.broadcasted_iota(jnp.int32, acc.shape, 1)
            acc = jnp.where(lane < (mask_limit - pl.program_id(1) * TL), acc, 0.0)
        outs[0][...] = acc.astype(outs[0].dtype)

    return kernel


# ---------------------------------------------------------------------------
# Layer wrapper: Conv1d(+BN+ReLU[+residual]) on NCL activations
# ---------------------------------------------------------------------------
def _conv_layer_ncl(x, L_valid, w_oik, bias, stride, *,
                    post_scale=None, post_shift=None, emit_raw=False,
                    residual=None, expand=None, mask_tail=True,
                    out_dtype=jnp.bfloat16, raw_dtype=jnp.float32,
                    target_tl=_TARGET_TL):
    """x: (N, C_in, Lx) with x[:, :, L_valid:] == 0.  w_oik: (C_out, C_in, K)
    (BN folds already applied).  Returns ([raw,] act, L_out) where raw/act are
    (N, C_out, L_out_pad) and act[:, :, L_out:] == 0 when mask_tail."""
    N, C_in, Lx = x.shape
    C_out, wci, K = w_oik.shape
    assert wci == C_in
    s = int(stride)
    pad = K // 2
    L_out = (L_valid + 2 * pad - K) // s + 1
    Q = -(-K // s)
    Kp = Q * s
    SC = s * C_in

    TL = min(target_tl, _round_up(L_out, _HALO))
    n_tiles = -(-L_out // TL)
    L_out_pad = n_tiles * TL
    M_pad = L_out_pad + _HALO                    # packed length incl. halo block
    Lp = s * M_pad

    # ---- polyphase-packed, zero-padded input Z : (N, SC, M_pad) bf16 -------
    xb = x.astype(jnp.bfloat16)
    if pad + Lx > Lp:                            # drop zero tail that can't fit
        xb = xb[:, :, :Lp - pad]
        Lx = Lp - pad
    xp = jnp.pad(xb, ((0, 0), (0, 0), (pad, Lp - pad - Lx)))
    if s == 1:
        z = xp
    else:
        z = xp.reshape(N, C_in, M_pad, s)
        z = jnp.transpose(z, (0, 3, 1, 2)).reshape(N, SC, M_pad)

    # ---- polyphase-packed taps : (C_out, Q*SC), row order (q, phase, c_in) --
    w_p = jnp.pad(w_oik.astype(jnp.float32), ((0, 0), (0, 0), (0, Kp - K)))
    w_p = w_p.reshape(C_out, C_in, Q, s)
    w_flat = jnp.transpose(w_p, (0, 2, 3, 1)).reshape(C_out, Q * SC)
    w_flat = w_flat.astype(jnp.bfloat16)

    halo_step = TL // _HALO
    inputs = [z, z, w_flat, bias.reshape(C_out, 1).astype(jnp.float32)]
    in_specs = [
        pl.BlockSpec((None, SC, TL), lambda n, j: (n, 0, j)),
        pl.BlockSpec((None, SC, _HALO), lambda n, j: (n, 0, (j + 1) * halo_step)),
        pl.BlockSpec((C_out, Q * SC), lambda n, j: (0, 0)),
        pl.BlockSpec((C_out, 1), lambda n, j: (0, 0)),
    ]
    if emit_raw:
        inputs += [post_scale.reshape(C_out, 1).astype(jnp.float32),
                   post_shift.reshape(C_out, 1).astype(jnp.float32)]
        in_specs += [pl.BlockSpec((C_out, 1), lambda n, j: (0, 0)),
                     pl.BlockSpec((C_out, 1), lambda n, j: (0, 0))]
    add_residual = residual is not None
    if add_residual:
        C0 = residual.shape[1]
        r = residual.astype(jnp.float32)
        if r.shape[2] < L_out_pad:
            r = jnp.pad(r, ((0, 0), (0, 0), (0, L_out_pad - r.shape[2])))
        inputs += [r, expand.astype(jnp.float32)]
        in_specs += [pl.BlockSpec((None, C0, TL), lambda n, j: (n, 0, j)),
                     pl.BlockSpec((C_out, C0), lambda n, j: (0, 0))]

    out_block = pl.BlockSpec((None, C_out, TL), lambda n, j: (n, 0, j))
    act_sds = jax.ShapeDtypeStruct((N, C_out, L_out_pad), out_dtype)
    if emit_raw:
        out_shape = (jax.ShapeDtypeStruct((N, C_out, L_out_pad), raw_dtype), act_sds)
        out_specs = (out_block, out_block)
    else:
        out_shape = act_sds
        out_specs = out_block

    mask_limit = L_out if (mask_tail and L_out_pad > L_out) else None

    flops = 2 * N * L_out_pad * (Q * SC) * C_out
    if add_residual:
        flops += 2 * N * L_out_pad * residual.shape[1] * C_out
    bytes_accessed = (
        N * n_tiles * (TL + _HALO) * SC * 2
        + C_out * (Q * SC) * 2 + C_out * 4 * (3 if emit_raw else 1)
        + N * L_out_pad * C_out * jnp.dtype(out_dtype).itemsize
        + (N * L_out_pad * C_out * jnp.dtype(raw_dtype).itemsize if emit_raw else 0)
        + (N * L_out_pad * residual.shape[1] * 4 if add_residual else 0))

    outs = pl.pallas_call(
        _make_conv_kernel(Q, TL, emit_raw, add_residual, mask_limit),
        grid=(N, n_tiles),
        out_shape=out_shape,
        in_specs=in_specs,
        out_specs=out_specs,
        compiler_params=pltpu.CompilerParams(
            dimension_semantics=("parallel", "parallel"),
            vmem_limit_bytes=_vmem_limit_bytes()),
        cost_estimate=pl.CostEstimate(flops=flops, transcendentals=0,
                                      bytes_accessed=bytes_accessed),
    )(*inputs)

    if emit_raw:
        raw, act = outs
        return raw, act, L_out
    return outs, L_out


# ---------------------------------------------------------------------------
# Parameters + forward
# ---------------------------------------------------------------------------
def init_params(key, in_c, kernel_sizes, out_channels):
    def bn_params(k, c):
        k1, k2, k3, k4 = jax.random.split(k, 4)
        gamma = jax.random.uniform(k1, (c,), jnp.float32, 0.8, 1.2)
        beta = 0.1 * jax.random.normal(k2, (c,), jnp.float32)
        mean = 0.1 * jax.random.normal(k3, (c,), jnp.float32)
        var = jax.random.uniform(k4, (c,), jnp.float32, 0.5, 1.5)
        return gamma, beta, mean, var

    key, k_norm = jax.random.split(key)
    params = {"norm": bn_params(k_norm, in_c), "layers": []}
    prev = in_c
    for K, c_out in zip(kernel_sizes, out_channels):
        key, kw, kb, kbn = jax.random.split(key, 4)
        w = jax.random.normal(kw, (c_out, prev, K), jnp.float32) / jnp.sqrt(prev * K)
        b = 0.05 * jax.random.normal(kb, (c_out,), jnp.float32)
        params["layers"].append({"w": w, "b": b, "bn": bn_params(kbn, c_out)})
        prev = c_out
    return params


def _bn_fold(bn):
    gamma, beta, mean, var = bn
    scale = gamma / jnp.sqrt(var + EPS)
    shift = beta - mean * scale
    return scale, shift


def pyramid_forward_pallas(x, params, strides, target_tl=_TARGET_TL):
    """x: (N, in_c, L) NCL (same layout as the PyTorch module)."""
    layers = params["layers"]
    assert len(layers) >= 2, "pyramid embedding expects >= 2 conv layers"

    # Input BatchNorm1d (eval mode) applied BEFORE zero padding -> exact borders.
    in_scale, in_shift = _bn_fold(params["norm"])
    h = x.astype(jnp.float32) * in_scale[None, :, None] + in_shift[None, :, None]
    L_valid = x.shape[2]

    f_raw = None
    f_len = None
    for i, lp in enumerate(layers):
        w = lp["w"].astype(jnp.float32)            # (C_out, C_in, K) torch layout
        b = lp["b"].astype(jnp.float32)
        s_bn, t_bn = _bn_fold(lp["bn"])
        last = i == len(layers) - 1

        if i == 0:
            # raw 'f' (pre-BN/ReLU) is needed for the residual -> apply this
            # layer's BN in the kernel epilogue; keep f in f32.
            f_raw, h, L_valid = _conv_layer_ncl(
                h, L_valid, w, b, strides[i],
                post_scale=s_bn, post_shift=t_bn, emit_raw=True,
                mask_tail=True, target_tl=target_tl)
            f_len = L_valid
        else:
            # fold this layer's BN into the conv weights/bias (exact)
            w_eff = w * s_bn[:, None, None]
            b_eff = b * s_bn + t_bn
            residual = expand = None
            if last:
                K = w.shape[2]
                L_out_last = (L_valid + 2 * (K // 2) - K) // strides[i] + 1
                if L_out_last != f_len:
                    raise ValueError(
                        "residual add needs the last conv length to equal the "
                        f"first conv length ({L_out_last} vs {f_len}); strides "
                        "after the first layer must be 1.")
                C0 = f_raw.shape[1]
                C_f = w.shape[0]
                idx = (np.arange(C_f) * C0) // C_f          # 'nearest' interp
                expand = jax.nn.one_hot(idx, C0, dtype=jnp.float32)
                residual = f_raw                             # expanded in-kernel
            h, L_valid = _conv_layer_ncl(
                h, L_valid, w_eff, b_eff, strides[i],
                residual=residual, expand=expand,
                mask_tail=not last,
                out_dtype=jnp.float32 if last else jnp.bfloat16,
                target_tl=target_tl)

    return h[:, :, :L_valid]


# ---------------------------------------------------------------------------
# Pure-JAX fp32 reference (for correctness check)
# ---------------------------------------------------------------------------
def pyramid_forward_ref(x, params, strides):
    def bn(y, p):
        g, b, m, v = p
        s = g / jnp.sqrt(v + EPS)
        return y * s[None, :, None] + (b - m * s)[None, :, None]

    x = bn(x, params["norm"])
    f = None
    for i, lp in enumerate(params["layers"]):
        K = lp["w"].shape[2]
        y = lax.conv_general_dilated(
            x, lp["w"], (strides[i],), [(K // 2, K // 2)],
            dimension_numbers=("NCH", "OIH", "NCH"),
            precision=lax.Precision.HIGHEST) + lp["b"][None, :, None]
        if i == 0:
            f = y
        x = jnp.maximum(bn(y, lp["bn"]), 0.0)
    C0, Cf = f.shape[1], x.shape[1]
    idx = (jnp.arange(Cf) * C0) // Cf
    return x + f[:, idx, :]


# ---------------------------------------------------------------------------
if __name__ == "__main__":
    key = jax.random.PRNGKey(0)
    N, in_c, L = 2, 4, 16
    kernel_sizes = (7, 3, 3)
    strides = (2, 1, 1)          # strides after the first must be 1 (residual add)
    out_channels = (8, 16, 32)

    key, kp, kx = jax.random.split(key, 3)
    params = init_params(kp, in_c, kernel_sizes, out_channels)
    x = jax.random.normal(kx, (N, in_c, L), jnp.float32)

    out = pyramid_forward_pallas(x, params, strides)
    out = jax.block_until_ready(out)

    ref = pyramid_forward_ref(x, params, strides)
    assert out.shape == ref.shape == (N, out_channels[-1], 8), out.shape
    out32 = jnp.asarray(out, jnp.float32)
    max_err = float(jnp.max(jnp.abs(out32 - ref)))
    # bf16 activations/weights through 3 conv layers vs fp32 HIGHEST reference.
    assert jnp.allclose(out32, ref, atol=5e-2, rtol=5e-2), max_err
    print("KERNEL_OK")
</pallas_src>

<mosaic_0001>
module attributes {stable_mosaic.version = 11 : i64} {
  func.func @kernel(%arg0: i32, %arg1: i32, %arg2: memref<1x8x128xbf16, #tpu.memory_space<vmem>>, %arg3: memref<1x8x128xbf16, #tpu.memory_space<vmem>>, %arg4: memref<8x32xbf16, #tpu.memory_space<vmem>>, %arg5: memref<8x1xf32, #tpu.memory_space<vmem>>, %arg6: memref<8x1xf32, #tpu.memory_space<vmem>>, %arg7: memref<8x1xf32, #tpu.memory_space<vmem>>, %arg8: memref<1x8x128xf32, #tpu.memory_space<vmem>>, %arg9: memref<1x8x128xbf16, #tpu.memory_space<vmem>>) attributes {dimension_semantics = [#tpu.dimension_semantics<parallel>, #tpu.dimension_semantics<parallel>], iteration_bounds = array<i64: 2, 1>, scalar_prefetch = 0 : i64, scratch_operands = 0 : i64, tpu.core_type = #tpu.core_type<tc>, window_params = [{transform_indices = @transform_0, window_bounds = array<i64: 1, 8, 128>}, {transform_indices = @transform_1, window_bounds = array<i64: 1, 8, 128>}, {pipeline_mode = #tpu.pipeline_mode<synchronous>, transform_indices = @transform_2, window_bounds = array<i64: 8, 32>}, {pipeline_mode = #tpu.pipeline_mode<synchronous>, transform_indices = @transform_3, window_bounds = array<i64: 8, 1>}, {pipeline_mode = #tpu.pipeline_mode<synchronous>, transform_indices = @transform_4, window_bounds = array<i64: 8, 1>}, {pipeline_mode = #tpu.pipeline_mode<synchronous>, transform_indices = @transform_5, window_bounds = array<i64: 8, 1>}, {transform_indices = @transform_6, window_bounds = array<i64: 1, 8, 128>}, {transform_indices = @transform_7, window_bounds = array<i64: 1, 8, 128>}]} {
    %c0 = arith.constant 0 : index
    %c0_0 = arith.constant 0 : index
    %c0_1 = arith.constant 0 : index
    %0 = vector.load %arg2[%c0, %c0_0, %c0_1] : memref<1x8x128xbf16, #tpu.memory_space<vmem>>, vector<1x8x128xbf16>
    %1 = vector.shape_cast %0 : vector<1x8x128xbf16> to vector<8x128xbf16>
    %2 = arith.extf %1 : vector<8x128xbf16> to vector<8x128xf32>
    %c0_2 = arith.constant 0 : index
    %c0_3 = arith.constant 0 : index
    %c0_4 = arith.constant 0 : index
    %3 = vector.load %arg3[%c0_2, %c0_3, %c0_4] : memref<1x8x128xbf16, #tpu.memory_space<vmem>>, vector<1x8x128xbf16>
    %4 = vector.shape_cast %3 : vector<1x8x128xbf16> to vector<8x128xbf16>
    %5 = arith.extf %4 : vector<8x128xbf16> to vector<8x128xf32>
    %6 = tpu.concatenate %2, %5 in 1 : vector<8x128xf32>, vector<8x128xf32> -> vector<8x256xf32>
    %7 = vector.extract_strided_slice %6 {offsets = [0, 0], sizes = [8, 128], strides = [1, 1]} : vector<8x256xf32> to vector<8x128xf32>
    %8 = vector.extract_strided_slice %6 {offsets = [0, 1], sizes = [8, 128], strides = [1, 1]} : vector<8x256xf32> to vector<8x128xf32>
    %9 = vector.extract_strided_slice %6 {offsets = [0, 2], sizes = [8, 128], strides = [1, 1]} : vector<8x256xf32> to vector<8x128xf32>
    %10 = vector.extract_strided_slice %6 {offsets = [0, 3], sizes = [8, 128], strides = [1, 1]} : vector<8x256xf32> to vector<8x128xf32>
    %11 = tpu.concatenate %7, %8, %9, %10 in 0 : vector<8x128xf32>, vector<8x128xf32>, vector<8x128xf32>, vector<8x128xf32> -> vector<32x128xf32>
    %c0_5 = arith.constant 0 : index
    %c0_6 = arith.constant 0 : index
    %12 = vector.load %arg4[%c0_5, %c0_6] : memref<8x32xbf16, #tpu.memory_space<vmem>>, vector<8x32xbf16>
    %13 = arith.truncf %11 : vector<32x128xf32> to vector<32x128xbf16>
    %cst = arith.constant dense<0.000000e+00> : vector<8x128xf32>
    %14 = tpu.matmul %12, %13, %cst {dimension_numbers = #tpu.dot_dimension_numbers<[1], [0], [0], [1], [0, 0, 1, 1], [], []>} : vector<8x32xbf16>, vector<32x128xbf16>, vector<8x128xf32> -> vector<8x128xf32>
    %c0_7 = arith.constant 0 : index
    %c0_8 = arith.constant 0 : index
    %15 = vector.load %arg5[%c0_7, %c0_8] : memref<8x1xf32, #tpu.memory_space<vmem>>, vector<8x1xf32>
    %16 = vector.broadcast %15 : vector<8x1xf32> to vector<8x128xf32>
    %17 = arith.addf %14, %16 : vector<8x128xf32>
    %c0_9 = arith.constant 0 : index
    %c0_10 = arith.constant 0 : index
    %c0_11 = arith.constant 0 : index
    %18 = vector.load %arg8[%c0_9, %c0_10, %c0_11] : memref<1x8x128xf32, #tpu.memory_space<vmem>>, vector<1x8x128xf32>
    %19 = vector.shape_cast %18 : vector<1x8x128xf32> to vector<8x128xf32>
    %20 = vector.shape_cast %17 : vector<8x128xf32> to vector<1x8x128xf32>
    tpu.vector_store %arg8[%c0_9, %c0_10, %c0_11], %20 {strides = array<i32>} : memref<1x8x128xf32, #tpu.memory_space<vmem>>, vector<1x8x128xf32>,
    %c0_12 = arith.constant 0 : index
    %c0_13 = arith.constant 0 : index
    %21 = vector.load %arg6[%c0_12, %c0_13] : memref<8x1xf32, #tpu.memory_space<vmem>>, vector<8x1xf32>
    %22 = vector.broadcast %21 : vector<8x1xf32> to vector<8x128xf32>
    %23 = arith.mulf %17, %22 : vector<8x128xf32>
    %c0_14 = arith.constant 0 : index
    %c0_15 = arith.constant 0 : index
    %24 = vector.load %arg7[%c0_14, %c0_15] : memref<8x1xf32, #tpu.memory_space<vmem>>, vector<8x1xf32>
    %25 = vector.broadcast %24 : vector<8x1xf32> to vector<8x128xf32>
    %26 = arith.addf %23, %25 : vector<8x128xf32>
    %cst_16 = arith.constant 0.000000e+00 : f32
    %27 = vector.broadcast %cst_16 : f32 to vector<8x128xf32>
    %28 = arith.maximumf %26, %27 : vector<8x128xf32>
    %29 = tpu.iota {dimensions = array<i32: 1>} : vector<8x128xi32>
    %c128_i32 = arith.constant 128 : i32
    %30 = arith.muli %arg1, %c128_i32 : i32
    %c8_i32 = arith.constant 8 : i32
    %31 = arith.subi %c8_i32, %30 : i32
    %32 = vector.broadcast %31 : i32 to vector<8x128xi32>
    %33 = arith.cmpi slt, %29, %32 : vector<8x128xi32>
    %cst_17 = arith.constant 0.000000e+00 : f32
    %34 = vector.broadcast %cst_17 : f32 to vector<8x128xf32>
    %35 = arith.select %33, %28, %34 : vector<8x128xi1>, vector<8x128xf32>
    %36 = arith.truncf %35 : vector<8x128xf32> to vector<8x128xbf16>
    %c0_18 = arith.constant 0 : index
    %c0_19 = arith.constant 0 : index
    %c0_20 = arith.constant 0 : index
    %37 = vector.load %arg9[%c0_18, %c0_19, %c0_20] : memref<1x8x128xbf16, #tpu.memory_space<vmem>>, vector<1x8x128xbf16>
    %38 = vector.shape_cast %37 : vector<1x8x128xbf16> to vector<8x128xbf16>
    %39 = vector.shape_cast %36 : vector<8x128xbf16> to vector<1x8x128xbf16>
    tpu.vector_store %arg9[%c0_18, %c0_19, %c0_20], %39 {strides = array<i32>} : memref<1x8x128xbf16, #tpu.memory_space<vmem>>, vector<1x8x128xbf16>,
    return
  }
  func.func @transform_0(%arg0: i32, %arg1: i32) -> (i32, i32, i32) {
    %c0_i32 = arith.constant 0 : i32
    %c0_i32_0 = arith.constant 0 : i32
    return %arg0, %c0_i32, %arg1 : i32, i32, i32
  }
  func.func @transform_1(%arg0: i32, %arg1: i32) -> (i32, i32, i32) {
    %c1_i32 = arith.constant 1 : i32
    %0 = arith.addi %arg1, %c1_i32 : i32
    %c1_i32_0 = arith.constant 1 : i32
    %1 = arith.muli %0, %c1_i32_0 : i32
    %c0_i32 = arith.constant 0 : i32
    %c0_i32_1 = arith.constant 0 : i32
    return %arg0, %c0_i32, %1 : i32, i32, i32
  }
  func.func @transform_2(%arg0: i32, %arg1: i32) -> (i32, i32) {
    %c0_i32 = arith.constant 0 : i32
    %c0_i32_0 = arith.constant 0 : i32
    %c0_i32_1 = arith.constant 0 : i32
    return %c0_i32, %c0_i32_0 : i32, i32
  }
  func.func @transform_3(%arg0: i32, %arg1: i32) -> (i32, i32) {
    %c0_i32 = arith.constant 0 : i32
    %c0_i32_0 = arith.constant 0 : i32
    %c0_i32_1 = arith.constant 0 : i32
    return %c0_i32, %c0_i32_0 : i32, i32
  }
  func.func @transform_4(%arg0: i32, %arg1: i32) -> (i32, i32) {
    %c0_i32 = arith.constant 0 : i32
    %c0_i32_0 = arith.constant 0 : i32
    %c0_i32_1 = arith.constant 0 : i32
    return %c0_i32, %c0_i32_0 : i32, i32
  }
  func.func @transform_5(%arg0: i32, %arg1: i32) -> (i32, i32) {
    %c0_i32 = arith.constant 0 : i32
    %c0_i32_0 = arith.constant 0 : i32
    %c0_i32_1 = arith.constant 0 : i32
    return %c0_i32, %c0_i32_0 : i32, i32
  }
  func.func @transform_6(%arg0: i32, %arg1: i32) -> (i32, i32, i32) {
    %c0_i32 = arith.constant 0 : i32
    %c0_i32_0 = arith.constant 0 : i32
    return %arg0, %c0_i32, %arg1 : i32, i32, i32
  }
  func.func @transform_7(%arg0: i32, %arg1: i32) -> (i32, i32, i32) {
    %c0_i32 = arith.constant 0 : i32
    %c0_i32_0 = arith.constant 0 : i32
    return %arg0, %c0_i32, %arg1 : i32, i32, i32
  }
}

</mosaic_0001>

<bundles_post_ra>
// kernel: tpu_custom_call.1
= control target key start
LH: loop header
LB: loop body
LE: loop exit
PB: predicated region body
PF: predicated region fallthrough
CT: control target
= control target key end

     0   :  { %13 = vsyncpa [#allocation3], 0  ;;  %s1175_s0 = inlined_call_operand.vmem [shape: bf16[2,8,256], index: 0, kind: input, shape index: {}]   ;;  %s1176_s1 = inlined_call_operand.hbm [shape: bf16[2,8,256], index: 1, kind: input, shape index: {}]   ;;  %s1177_s2 = inlined_call_operand.vmem [shape: bf16[8,32], index: 2, kind: input, shape index: {}]   ;;  %s1178_s3 = inlined_call_operand.vmem [shape: f32[8,1], index: 3, kind: input, shape index: {}]   ;;  %s1179_s4 = inlined_call_operand.vmem [shape: f32[8,1], index: 4, kind: input, shape index: {}]   ;;  %s1180_s5 = inlined_call_operand.vmem [shape: f32[8,1], index: 5, kind: input, shape index: {}]   ;;  %s1181_s6 = inlined_call_operand.hbm [shape: f32[2,8,128], index: 6, kind: output, shape index: {0}]   ;;  %s1182_s7 = inlined_call_operand.hbm [shape: bf16[2,8,128], index: 7, kind: output, shape index: {1}]  }
   0x1   :  { %15 = vsyncpa [#allocation3 + $0x1], 0 }
   0x2   :  { %16 = vsyncpa [#allocation4], 0 }
   0x3   :  { %18 = vsyncpa [#allocation4 + $0x1], 0 }
   0x4   :  { %19 = vsyncpa [#allocation7], 0 }
   0x5   :  { %21 = vsyncpa [#allocation7 + $0x1], 0  ;;  %s952_s24 = smov 0   ;;  %s954_s25 = smov 0  }
   0x6   :  { %s956_s26 = smov 0   ;;  %s958_s27 = smov 0  }
   0x7   :  { %s960_s28 = smov 0   ;;  %s962_s29 = smov 0  }
   0x8 LB: > { %s633_s30 = sadd.s32 4294967295, %s901_s29   ;;  %s634_s8 = sadd.s32 4294967294, %s901_s29   ;;  %s901_s29 = sphi %s962_s29, %s27_s29   ;;  %s897_s28 = sphi %s960_s28, %s1198_s28   ;;  %s893_s27 = sphi %s958_s27, %s1197_s27   ;;  %s889_s26 = sphi %s956_s26, %s1196_s26   ;;  %s885_s25 = sphi %s954_s25, %s1195_s25   ;;  %s881_s24 = sphi %s952_s24, %s1194_s24  }
   0x9   : > { %s39_s9 = sadd.s32 1, %s897_s28  ;;  %s78_s10 = sadd.s32 1, %s889_s26 }
   0xa   : > { %p41_p0 = scmp.ge.s32.totalorder %s39_s9, 2  ;;  %p85_p1 = scmp.ne.s32.totalorder %s889_s26, %s885_s25 }
   0xb   : > { %p86_p2 = scmp.eq.s32.totalorder %s901_s29, 0  ;;  %p91_p3 = scmp.ne.s32.totalorder %s885_s25, %s881_s24 }
   0xc   : > { %s1200_s9 = smov (%p41_p0, %s39_s9), 0  ;;  %p92_p5 = scmp.eq.s32.totalorder %s633_s30, 0 }
   0xd   : > { %p993_p4 = por %p86_p2, %p85_p1  ;;  %s73_s12 = ssub.s32 %s897_s28, %s1200_s9 }
   0xe   : > { %p201_p6 = scmp.eq.s32.totalorder %s633_s30, 1  ;;  %p76_p7 = scmp.eq.s32.totalorder %s73_s12, 0 }
   0xf   : > { %p999_p8 = por %p92_p5, %p91_p3  ;;  %p207_p10 = scmp.eq.s32.totalorder %s634_s8, 1 }
  0x10   : > { %p1003_p9 = por %p201_p6, %p85_p1  ;;  %p683_p13 = scmp.lt.s32.totalorder %s901_s29, 2 }
  0x11   : > { %s1008_s15 = scalar_select %p76_p7, %s889_s26, %s78_s10  }
  0x12   : > { %s1186_s14 = scalar_select %p1003_p9, 1, 0 }
  0x13   : > { %p1010_p11 = por %p207_p10, %p91_p3  ;;  %s278_s17 = sand.u32 1, %s889_s26  }
  0x14   : > { %s637_s18 = sshll.u32 %s278_s17, 2  ;;  %s653_s19 = sshll.u32 %s897_s28, 7 }
  0x15   : > { %s1187_s16 = scalar_select %p1010_p11, 1, 0 }
  0x16   : > { %s546_s22 = scalar_lea.hbm %s1176_s1, %s653_s19  ;;  %s282_s23 = scalar_lea.vmem [#allocation2], %s637_s18 }
  0x17   : > { %s292_s30 = sshll.u32 %s282_s23, 4  ;;  %s1021_s12 = scalar_lea.hbm %s546_s22, 64  ;;  %s1023_s30 = int_to_ptr.vmem [resolvable:$true] %s292_s30 }
  0x18   : > { %p1027_p0 = pnand %p683_p13, %p993_p4  ;;  %s279_s10 = scalar_lea.sflag [#allocation3], %s278_s17 }
  0x19   : > { %s786_s19 = scalar_lea.hbm %s546_s22, 128  ;;  %s761_s11 = scalar_lea.hbm %s1176_s1, 256 }
  0x1a   : > { %p757_p3 = scmp.ne.s32.totalorder %s1021_s12, %s786_s19  ;;  %p758_p5 = pneg %p1027_p0 }
  0x1b   : > { %p762_p4 = scmp.lt.u32.totalorder %s1021_s12, %s1176_s1  ;;  %p763_p10 = scmp.lt.u32.totalorder %s761_s11, %s786_s19 }
  0x1c   : > { %p759_p6 = pnand %p758_p5, %p757_p3  ;;  %p765_p12 = scmp.lt.u32.totalorder %s786_s19, %s1021_s12 }
  0x1d   : > { %p764_p13 = por %p763_p10, %p762_p4 }
  0x1e   : > { %p760_p7 = pneg %p759_p6 }
  0x1f   : > { %p766_p1 = por %p765_p12, %p764_p13 }
  0x21   : > { %p767_p2 = pnand %p766_p1, %p760_p7 }
  0x23   : > { %770 = shalt.err (!%p767_p2)
}
  0x24   : > { %s771_s17 = scalar_lea.vmem %s1023_s30, 64  ;;  %s903_s22 = smov [#allocation2]  }
  0x25   : > { %p772_p3 = scmp.ne.s32.totalorder %s1023_s30, %s771_s17  ;;  %s776_s18 = sshll.u32 %s903_s22, 4  ;;  %s777_s18 = int_to_ptr.vmem [resolvable:$false] %s776_s18 }
  0x26   : > { %s778_s20 = scalar_lea.vmem %s777_s18, 128  ;;  %p779_p9 = scmp.lt.s32.totalorder %s1023_s30, %s777_s18 }
  0x27   : > { %p774_p6 = pnand %p772_p3, %p758_p5  ;;  %p780_p4 = scmp.lt.s32.totalorder %s778_s20, %s771_s17 }
  0x29   : > { %p775_p11 = pneg %p774_p6  ;;  %p781_p10 = por %p780_p4, %p779_p9 }
  0x2b   : > { %p782_p12 = pnand %p781_p10, %p775_p11 }
  0x2d   : > { %785 = shalt.err (!%p782_p12)
}
  0x2e   : > { %675 = dma.hbm_to_vmem [thread:$0]  (!%p1027_p0), %s1021_s12, 64, %s1023_s30, %s279_s10  }
  0x2f   : > { %p1189_p1 = scmp.lt.s32.totalorder %s901_s29, 3  ;;  %p1190_p2 = scmp.ge.s32.totalorder %s901_s29, 1 }
  0x31   : > { %p298_p5 = pnand %p1190_p2, %p1189_p1 }
  0x32   : > { %s1062_s19 = sand.u32 (!%p298_p5), 1, %s885_s25  }
  0x33   : > { %301 = sbr.rel (%p298_p5) target bundleno = 450 (0x1c2), region = 44  ;;  %s641_s11 = sshll.u32 (!%p298_p5), %s1062_s19, 2 }
  0x34   : > { %s304_s21 = scalar_lea.sflag (!%p298_p5), [#allocation3], %s1062_s19  ;;  %s307_s8 = scalar_lea.vmem (!%p298_p5), [#allocation2], %s641_s11 }
  0x3a   : > { %868 = dma.done.wait (%p999_p8), %s304_s21, 64  }
  0x3b   : > { %870 = vsyncadd (%p999_p8), %s304_s21, 4294967232  ;;  %p351_p9 = scmp.lt.s32.totalorder %s893_s27, 1  ;;  %v904_v0 = vmov 0.0   ;;  %v363_v2 = vld [vmem:[%s307_s8] sm:$0xf]  ;;  %vm905_vm0 = vmmov 0   ;;  %v457_v26 = vlaneseq }
  0x3c   : > { %658 = vmatprep.subr.bf16.mxu0 %v904_v0  ;;  %v364_v4 = vunpack.c.l.bf16 %v363_v2  ;;  %662 = vmatprep.mubr.msk.bf16.mxu0 %vm905_vm0, %v904_v0  ;;  %s906_s13 = smov 127   ;;  %s907_s22 = smov 125   ;;  %v908_v6 = vmov 0   ;;  %v391_v7 = vld [vmem:[%s1178_s3] sm:$0xff]  ;;  %vm371_vm1 = vcmask 1039360   ;;  %vm385_vm2 = vcmask 1022976  }
  0x3d   : > { %s352_s30 = scalar_select %p351_p9, %s893_s27, 1  ;;  %754 = vset.pattern.permute.xlu1 %v908_v6  ;;  %755 = vset.pattern.permute.xlu0 %v908_v6  ;;  %v449_v8 = vld [vmem:[%s1180_s5] sm:$0xff]  ;;  %vm378_vm3 = vcmask 1031168   ;;  %vm397_vm4 = vcmask 261120   ;;  %v458_v31 = vand.u32 127, %v457_v26 }
  0x3e   : > { %s909_s21 = smov 126   ;;  %v442_v9 = vld [vmem:[%s1179_s4] sm:$0xff]  ;;  %p1191_p11 = scmp.ne.s32.totalorder %s1186_s14, 0 }
  0x3f   : > { %s654_s12 = sshll.u32 %s352_s30, 3  ;;  %v388_v24 = vld [vmem:[%s1177_s2] sm:$0xf]  ;;  %s910_s23 = smov [#allocation5]  }
  0x40   : > { %s358_s17 = scalar_lea.vmem %s1175_s0, %s654_s12  ;;  %s467_s12 = scalar_lea.sflag [#allocation4], %s1062_s19 }
  0x41   : > { %v361_v1 = vld [vmem:[%s358_s17] sm:$0xf]  ;;  %s791_s17 = sshll.u32 %s910_s23, 4  ;;  %s792_s17 = int_to_ptr.vmem [resolvable:$false] %s791_s17 }
  0x42   : > { %v362_v3 = vunpack.c.l.bf16 %v361_v1 }
  0x44   : > { %v739_v5 = vpack.i.bf16 %v364_v4, %v362_v3 }
  0x46   : > { %740 = vrot.lane.b32.xlu0 %v739_v5, %s906_s13  ;;  %750 = vrot.lane.b32.xlu1 %v739_v5, %s907_s22  ;;  %s642_s13 = sshll.u32 %s1062_s19, 3  ;;  %s649_s22 = sshll.u32 %s893_s27, 7 }
  0x47   : > { %s343_s18 = scalar_lea.vmem [#allocation5], %s642_s13  ;;  %s1094_s30 = scalar_lea.hbm %s1181_s6, %s649_s22 }
  0x48   : > { %s486_s20 = sshll.u32 %s343_s18, 4  ;;  %s793_s13 = scalar_lea.vmem %s792_s17, 256  ;;  %s1096_s20 = int_to_ptr.vmem [resolvable:$true] %s486_s20 }
  0x49   : > { %s787_s10 = scalar_lea.vmem %s1096_s20, 128  ;;  %p794_p13 = scmp.lt.s32.totalorder %s1096_s20, %s792_s17 }
  0x4a   : > { %745 = vrot.lane.b32.xlu0 %v739_v5, %s909_s21  ;;  %394 = vperm.xlu1 %754, %v391_v7   ;;  %p788_p8 = scmp.ne.s32.totalorder %s1096_s20, %s787_s10  ;;  %p795_p3 = scmp.lt.s32.totalorder %s793_s13, %s787_s10 }
  0x4c   : > { %p789_p0 = pnand %p788_p8, %p1191_p11  ;;  %p796_p6 = por %p795_p3, %p794_p13 }
  0x4e   : > { %452 = vperm.xlu1 %754, %v449_v8   ;;  %445 = vperm.xlu0 %755, %v442_v9   ;;  %p790_p7 = pneg %p789_p0 }
  0x50   : > { %p797_p4 = pnand %p796_p6, %p790_p7 }
  0xb8   : > { %v741_v10 = vpop.permute.xlu0 %740  ;;  %v751_v11 = vpop.permute.xlu1 %750 }
  0xb9   : > { %v743_v12 = vunpack.i.h.bf16 %v741_v10  ;;  %v742_v13 = vunpack.i.l.bf16 %v741_v10  ;;  %v753_v14 = vunpack.i.h.bf16 %v751_v11  ;;  %v752_v15 = vunpack.i.l.bf16 %v751_v11 }
  0xbb   : > { %v372_v16 = vsel %vm371_vm1, %v742_v13, %v743_v12  ;;  %v386_v21 = vsel %vm385_vm2, %v752_v15, %v753_v14 }
  0xbc   : > { %v746_v17 = vpop.permute.xlu0 %745  ;;  %v389_v18 = vpack.c.bf16 %v372_v16, %v362_v3 }
  0xbd   : > { %v748_v19 = vunpack.i.h.bf16 %v746_v17  ;;  %v747_v20 = vunpack.i.l.bf16 %v746_v17 }
  0xbe   : > { %659 = vmatpush3.bf16.msra.mxu0 %v389_v18 }
  0xbf   : > { %660 = vmatprep.subr.bf16.mxu0 %v904_v0  ;;  %v379_v22 = vsel %vm378_vm3, %v747_v20, %v748_v19 }
  0xc0   : > { %v390_v23 = vpack.c.bf16 %v386_v21, %v379_v22 }
  0xc2   : > { %661 = vmatpush3.bf16.msra.mxu0 %v390_v23 }
  0xc5   : > { %663 = vmatmul.mubr.msk.bf16.vlgmr.msra.gmra.mrb[0].mxu0 %vm397_vm4, %v388_v24 }
  0xc9   : > { %v395_v25 = vpop.permute.xlu1 %394 }
  0xcd   : > { %v446_v28 = vpop.permute.xlu0 %445  ;;  %v453_v35 = vpop.permute.xlu1 %452 }
 0x198   : > { %v435_v27 = vpop.f32.mrb[0].mxu0 }
 0x199   : > { %v436_v29 = vadd.f32 %v435_v27, %v395_v25  ;;  %v664_v30 = vpop.f32.mrb[1].mxu0 }
 0x19a   : > { %v438_v32 = vpop.f32.mrb[2].mxu0 }
 0x19b   : > { %441 = vst [vmem:[%s343_s18] sm:$0xff] %v436_v29  ;;  %v448_v33 = vmul.f32 %v446_v28, %v436_v29  ;;  %v665_v34 = vpop.f32.mrb[3].mxu0 }
 0x19c   : > { %800 = shalt.err (!%p797_p4)
}
 0x19d   : > { %s801_s22 = scalar_lea.hbm %s1094_s30, 128  ;;  %s805_s8 = scalar_lea.hbm %s1181_s6, 256 }
 0x19e   : > { %p802_p10 = scmp.ne.s32.totalorder %s1094_s30, %s801_s22  ;;  %p806_p2 = scmp.lt.u32.totalorder %s1094_s30, %s1181_s6 }
 0x19f   : > { %p807_p5 = scmp.lt.u32.totalorder %s805_s8, %s801_s22  ;;  %p809_p8 = scmp.lt.u32.totalorder %s801_s22, %s1094_s30 }
 0x1a0   : > { %p803_p12 = pnand %p802_p10, %p1191_p11 }
 0x1a1   : > { %p808_p9 = por %p807_p5, %p806_p2 }
 0x1a2   : > { %p804_p1 = pneg %p803_p12 }
 0x1a3   : > { %p810_p0 = por %p809_p8, %p808_p9 }
 0x1a5   : > { %p811_p7 = pnand %p810_p0, %p804_p1 }
 0x1a7   : > { %814 = shalt.err (!%p811_p7)
}
 0x1a8   : > { %668 = dma.vmem_to_hbm [thread:$0]  (%p1191_p11), %s1096_s20, 128, %s1094_s30, %s467_s12   ;;  %v455_v36 = vadd.f32 %v453_v35, %v448_v33  ;;  %vm462_vm5 = vcmp.lt.s32.totalorder %v458_v31, 8 }
 0x1a9   : > { %s650_s10 = sshll.u32 %s893_s27, 6  ;;  %s350_s13 = scalar_lea.vmem [#allocation6], %s641_s11 }
 0x1aa   : > { %v456_v37 = vmax.f32 %v455_v36, 0.0  ;;  %s500_s18 = sshll.u32 %s350_s13, 4  ;;  %s1126_s8 = scalar_lea.hbm %s1182_s7, %s650_s10  ;;  %s1128_s18 = int_to_ptr.vmem [resolvable:$true] %s500_s18 }
 0x1ab   : > { %s472_s20 = scalar_lea.sflag [#allocation7], %s1062_s19  ;;  %s815_s30 = scalar_lea.vmem %s1128_s18, 64 }
 0x1ac   : > { %v463_v38 = vsel %vm462_vm5, %v456_v37, 0.0  ;;  %p816_p13 = scmp.ne.s32.totalorder %s1128_s18, %s815_s30  ;;  %s911_s27 = smov [#allocation6]  }
 0x1ad   : > { %v464_v39 = vpack.c.bf16 %v463_v38, %v463_v38  ;;  %s819_s11 = sshll.u32 %s911_s27, 4  ;;  %s820_s11 = int_to_ptr.vmem [resolvable:$false] %s819_s11 }
 0x1ae   : > { %p817_p3 = pnand %p816_p13, %p1191_p11  ;;  %s821_s12 = scalar_lea.vmem %s820_s11, 128 }
 0x1af   : > { %465 = vst [vmem:[%s350_s13] sm:$0xf] %v464_v39  ;;  %p822_p4 = scmp.lt.s32.totalorder %s1128_s18, %s820_s11  ;;  %p823_p10 = scmp.lt.s32.totalorder %s821_s12, %s815_s30 }
 0x1b0   : > { %p818_p6 = pneg %p817_p3 }
 0x1b1   : > { %p824_p12 = por %p823_p10, %p822_p4 }
 0x1b3   : > { %p825_p1 = pnand %p824_p12, %p818_p6 }
 0x1b5   : > { %828 = shalt.err (!%p825_p1)
}
 0x1b6   : > { %s829_s19 = scalar_lea.hbm %s1126_s8, 64  ;;  %s833_s10 = scalar_lea.hbm %s1182_s7, 128 }
 0x1b7   : > { %p830_p2 = scmp.ne.s32.totalorder %s1126_s8, %s829_s19  ;;  %p834_p8 = scmp.lt.u32.totalorder %s1126_s8, %s1182_s7 }
 0x1b8   : > { %p835_p0 = scmp.lt.u32.totalorder %s833_s10, %s829_s19  ;;  %p837_p13 = scmp.lt.u32.totalorder %s829_s19, %s1126_s8 }
 0x1b9   : > { %p831_p5 = pnand %p830_p2, %p1191_p11 }
 0x1ba   : > { %p836_p7 = por %p835_p0, %p834_p8 }
 0x1bb   : > { %p832_p9 = pneg %p831_p5 }
 0x1bc   : > { %p838_p3 = por %p837_p13, %p836_p7 }
 0x1be   : > { %p839_p6 = pnand %p838_p3, %p832_p9 }
 0x1c0   : > { %842 = shalt.err (!%p839_p6)
}
 0x1c1   : > { %669 = dma.vmem_to_hbm [thread:$0]  (%p1191_p11), %s1128_s18, 64, %s1126_s8, %s472_s20  }
 0x1c2 PF: > { %s512_s21 = sand.u32 1, %s881_s24   ;;  %p1192_p4 = scmp.ne.s32.totalorder %s1187_s16, 0 }
 0x1c3   : > { %p1193_p10 = scmp.ge.s32.totalorder %s901_s29, 2  ;;  %s513_s30 = scalar_lea.sflag [#allocation4], %s512_s21 }
 0x1c5   : > { %p677_p12 = pnand %p1193_p10, %p1192_p4 }
 0x1c7   : > { %872 = dma.done.wait (!%p677_p12), %s513_s30, 128  }
 0x1c8   : > { %874 = vsyncadd (!%p677_p12), %s513_s30, 4294967168  ;;  %s522_s27 = scalar_lea.sflag [#allocation7], %s512_s21 }
 0x1c9   : > { %876 = dma.done.wait (!%p677_p12), %s522_s27, 64  }
 0x1ca   : > { %878 = vsyncadd (!%p677_p12), %s522_s27, 4294967232  ;;  %s27_s29 = sadd.s32 1, %s901_s29   ;;  %s1194_s24 = smov %s885_s25 }
 0x1cb   : > { %p24_p1 = scmp.ge.s32.totalorder %s27_s29, 4   ;;  %s1195_s25 = smov %s889_s26 }
 0x1cc   : > { %s1196_s26 = smov %s1008_s15  ;;  %s1197_s27 = smov %s897_s28 }
 0x1cd   : > { %s1198_s28 = smov %s1200_s9  ;;  %26 = sbr.rel (!%p24_p1) target bundleno = 8 (0x8), region = 109 }
 0x1d4   :  { %527 = vsyncpa [#allocation3], 1 }
 0x1d5   :  { %529 = vsyncpa [#allocation3 + $0x1], 1 }
 0x1d6   :  { %530 = vsyncpa [#allocation4], 1 }
 0x1d7   :  { %532 = vsyncpa [#allocation4 + $0x1], 1 }
 0x1d8   :  { %533 = vsyncpa [#allocation7], 1 }
 0x1d9   :  { %535 = vsyncpa [#allocation7 + $0x1], 1 }

</bundles_post_ra>
